<compile_context>
chip_gen: v5e
topology: v5e:2x2
jax: 0.10.0
libtpu: 0.0.40
codegen_flags: <defaults>
</compile_context>

<pallas_src>
import functools

import jax
import jax.numpy as jnp
import numpy as np
from jax.experimental import pallas as pl
from jax.experimental.pallas import tpu as pltpu


# --- Joint sin/cos (shared Cody-Waite range reduction, f32) -----------------

_TWO_OVER_PI = np.float32(0.63661977236758134308)
# SLEEF-style 4-part split of pi (halved -> pi/2); each piece has few mantissa
# bits so q * piece is exact for the |q| <~ 2^11 this module produces.
_PI2_A = np.float32(3.140625 * 0.5)
_PI2_B = np.float32(0.0009670257568359375 * 0.5)
_PI2_C = np.float32(6.2771141529083251953e-07 * 0.5)
_PI2_D = np.float32(1.2154201256553420762e-10 * 0.5)

# Cephes single-precision minimax coefficients, valid on |r| <= pi/4.
_SIN_C0 = np.float32(-1.9515295891e-4)
_SIN_C1 = np.float32(8.3321608736e-3)
_SIN_C2 = np.float32(-1.6666654611e-1)
_COS_C0 = np.float32(2.443315711809948e-5)
_COS_C1 = np.float32(-1.388731625493765e-3)
_COS_C2 = np.float32(4.166664568298827e-2)


def _sincos(theta):
    """Return (sin(theta), cos(theta)) in f32 with one shared range reduction."""
    # Quadrant: q = round(theta * 2/pi)  (round-half-up; ties are harmless).
    q = jnp.floor(theta * _TWO_OVER_PI + np.float32(0.5))
    # Cody-Waite reduction: r = theta - q*pi/2, |r| <= pi/4 (+eps).
    r = theta - q * _PI2_A
    r = r - q * _PI2_B
    r = r - q * _PI2_C
    r = r - q * _PI2_D
    r2 = r * r
    # sin(r) = r + r^3 * P(r^2)
    ps = _SIN_C0 * r2 + _SIN_C1
    ps = ps * r2 + _SIN_C2
    sin_r = r + r * r2 * ps
    # cos(r) = 1 - r^2/2 + r^4 * Q(r^2)
    pc = _COS_C0 * r2 + _COS_C1
    pc = pc * r2 + _COS_C2
    cos_r = np.float32(1.0) - np.float32(0.5) * r2 + (r2 * r2) * pc
    # Quadrant fix-up (two's-complement & gives q mod 4 correctly for q < 0).
    qi = q.astype(jnp.int32)
    swap = (qi & 1) == 1
    sin_t = jnp.where(swap, cos_r, sin_r)
    cos_t = jnp.where(swap, sin_r, cos_r)
    sin_t = jnp.where((qi & 2) == 2, -sin_t, sin_t)
    cos_t = jnp.where(((qi + 1) & 2) == 2, -cos_t, cos_t)
    return sin_t, cos_t


# --- Kernel ------------------------------------------------------------------

def _fourier_kernel(x_ref, w_ref, out_ref, *, row_chunk):
    # x_ref:   (TN, 1)  input rows (padded/garbage rows past N are masked on store)
    # w_ref:   (1, H)   f32, already scaled by 2*pi, VMEM-resident across steps
    # out_ref: (TN, 2H) [cos | sin]
    h = w_ref.shape[1]
    rows = x_ref.shape[0]
    w = w_ref[...]                      # hoisted once per grid step
    n_chunks = rows // row_chunk        # static; TN is a multiple of row_chunk

    @pl.loop(0, n_chunks)
    def _(ci):
        r0 = pl.multiple_of(ci * row_chunk, row_chunk)
        x = x_ref[pl.ds(r0, row_chunk), :].astype(jnp.float32)   # (rc, 1)
        theta = x * w                                             # (rc, H) VPU outer product
        sin_t, cos_t = _sincos(theta)
        out_ref[pl.ds(r0, row_chunk), pl.ds(0, h)] = cos_t.astype(out_ref.dtype)
        out_ref[pl.ds(r0, row_chunk), pl.ds(h, h)] = sin_t.astype(out_ref.dtype)


# --- Wrapper -----------------------------------------------------------------

def fourier_embedding(x, freqs, *, block_rows=4096, row_chunk=256, out_dtype=None):
    """x: (N,) float array, freqs: (C/2,) float array -> (N, C) embedding."""
    n = x.shape[0]
    h = freqs.shape[0]
    c = 2 * h
    if out_dtype is None:
        out_dtype = x.dtype
    out_bytes = np.dtype(out_dtype).itemsize

    def _rdown8(v):
        return max(8, (int(v) // 8) * 8)

    # VMEM budget for the double-buffered tiles (out tile + lane-padded x tile);
    # ~40 MiB keeps healthy headroom on v7x's 64 MiB per-TC VMEM.
    tile_budget = 40 * 1024 * 1024
    per_row = 2 * (c * out_bytes + 128 * 4)
    vmem_rows = max(8, tile_budget // per_row)
    # Cap at ~N/2 rows so the "parallel" axis has >= 2 steps when N allows
    # (keeps both v7x TensorCores busy); also limits wasted compute on the
    # masked partial last block.
    half_rows = max(8, (n + 1) // 2)

    tn = _rdown8(min(block_rows, vmem_rows, half_rows))
    rc = _rdown8(min(row_chunk, tn))
    tn = max(rc, (tn // rc) * rc)        # whole number of in-kernel row chunks

    # Fold the 2*pi scale into freqs once on the host side (f32 in-kernel math).
    w = (freqs.astype(jnp.float32) * np.float32(2.0 * np.pi)).reshape(1, h)
    x2d = x.reshape(n, 1)

    kernel = functools.partial(_fourier_kernel, row_chunk=rc)
    return pl.pallas_call(
        kernel,
        out_shape=jax.ShapeDtypeStruct((n, c), out_dtype),
        grid=(pl.cdiv(n, tn),),
        in_specs=[
            pl.BlockSpec((tn, 1), lambda i: (i, 0)),    # x rows, pipelined over N
            pl.BlockSpec((1, h), lambda i: (0, 0)),     # 2*pi*freqs, resident
        ],
        out_specs=pl.BlockSpec((tn, c), lambda i: (i, 0)),
        compiler_params=pltpu.CompilerParams(
            dimension_semantics=("parallel",),           # shards N across TCs on v7x
            vmem_limit_bytes=64 * 1024 * 1024,
        ),
        cost_estimate=pl.CostEstimate(
            flops=int(30 * n * h),
            transcendentals=0,
            bytes_accessed=int(4 * n + 4 * h + n * c * out_bytes),
        ),
    )(x2d, w)


# --- Reference (ground truth: f32 phase, f64 sin/cos) -------------------------

def fourier_embedding_ref(x, freqs):
    xf = np.asarray(x, dtype=np.float32)
    wf = np.asarray(freqs, dtype=np.float32) * np.float32(2.0 * np.pi)
    theta = (xf[:, None] * wf[None, :]).astype(np.float64)   # same f32 phase as kernel
    return np.concatenate([np.cos(theta), np.sin(theta)], axis=1)


if __name__ == "__main__":
    key = jax.random.PRNGKey(0)
    k_x1, k_f1, k_x2, k_f2 = jax.random.split(key, 4)
    scale = 16.0

    # --- Case 1: module defaults (num_channels=32), tiny batch.
    num_channels1, batch1 = 32, 8
    freqs1 = jax.random.normal(k_f1, (num_channels1 // 2,), dtype=jnp.float32) * scale
    x1 = jax.random.normal(k_x1, (batch1,), dtype=jnp.float32)
    out1 = jax.block_until_ready(fourier_embedding(x1, freqs1))
    assert out1.shape == (batch1, num_channels1), out1.shape
    np.testing.assert_allclose(np.asarray(out1, np.float64),
                               fourier_embedding_ref(x1, freqs1),
                               rtol=1e-5, atol=1e-5)

    # --- Case 2: lane-aligned halves (C=256), non-divisible batch ->
    # masked partial last block, multi-step grid, multiple in-kernel chunks.
    num_channels2, batch2 = 256, 300
    freqs2 = jax.random.normal(k_f2, (num_channels2 // 2,), dtype=jnp.float32) * scale
    x2 = jax.random.normal(k_x2, (batch2,), dtype=jnp.float32)
    out2 = jax.block_until_ready(
        fourier_embedding(x2, freqs2, block_rows=128, row_chunk=64))
    assert out2.shape == (batch2, num_channels2), out2.shape
    np.testing.assert_allclose(np.asarray(out2, np.float64),
                               fourier_embedding_ref(x2, freqs2),
                               rtol=1e-5, atol=1e-5)

    print("KERNEL_OK")
</pallas_src>

<mosaic_0001>
module attributes {stable_mosaic.version = 11 : i64} {
  func.func @_fourier_kernel(%arg0: i32, %arg1: memref<8x1xf32, #tpu.memory_space<vmem>>, %arg2: memref<1x16xf32, #tpu.memory_space<vmem>>, %arg3: memref<8x32xf32, #tpu.memory_space<vmem>>) attributes {dimension_semantics = [#tpu.dimension_semantics<parallel>], iteration_bounds = array<i64: 1>, scalar_prefetch = 0 : i64, scratch_operands = 0 : i64, tpu.core_type = #tpu.core_type<tc>, window_params = [{transform_indices = @transform_0, window_bounds = array<i64: 8, 1>}, {pipeline_mode = #tpu.pipeline_mode<synchronous>, transform_indices = @transform_1, window_bounds = array<i64: 1, 16>}, {transform_indices = @transform_2, window_bounds = array<i64: 8, 32>}]} {
    %c0 = arith.constant 0 : index
    %c0_0 = arith.constant 0 : index
    %0 = vector.load %arg2[%c0, %c0_0] : memref<1x16xf32, #tpu.memory_space<vmem>>, vector<1x16xf32>
    %c0_i32 = arith.constant 0 : i32
    %c1_i32 = arith.constant 1 : i32
    %1 = arith.muli %c0_i32, %c1_i32 : i32
    %c0_i32_1 = arith.constant 0 : i32
    %2 = arith.addi %c0_i32_1, %1 : i32
    %c8_i32 = arith.constant 8 : i32
    %3 = arith.muli %2, %c8_i32 : i32
    %4 = tpu.assume_multiple %3, 8 : i32
    %5 = arith.index_cast %4 : i32 to index
    %c0_2 = arith.constant 0 : index
    %6 = vector.load %arg1[%5, %c0_2] : memref<8x1xf32, #tpu.memory_space<vmem>>, vector<8x1xf32>
    %7 = vector.broadcast %6 : vector<8x1xf32> to vector<8x16xf32>
    %8 = vector.broadcast %0 : vector<1x16xf32> to vector<8x16xf32>
    %9 = arith.mulf %7, %8 : vector<8x16xf32>
    %cst = arith.constant 0.636619746 : f32
    %10 = vector.broadcast %cst : f32 to vector<8x16xf32>
    %11 = arith.mulf %9, %10 : vector<8x16xf32>
    %cst_3 = arith.constant 5.000000e-01 : f32
    %12 = vector.broadcast %cst_3 : f32 to vector<8x16xf32>
    %13 = arith.addf %11, %12 : vector<8x16xf32>
    %14 = math.floor %13 : vector<8x16xf32>
    %cst_4 = arith.constant 1.5703125 : f32
    %15 = vector.broadcast %cst_4 : f32 to vector<8x16xf32>
    %16 = arith.mulf %14, %15 : vector<8x16xf32>
    %17 = arith.subf %9, %16 : vector<8x16xf32>
    %cst_5 = arith.constant 4.83512878E-4 : f32
    %18 = vector.broadcast %cst_5 : f32 to vector<8x16xf32>
    %19 = arith.mulf %14, %18 : vector<8x16xf32>
    %20 = arith.subf %17, %19 : vector<8x16xf32>
    %cst_6 = arith.constant 3.13855708E-7 : f32
    %21 = vector.broadcast %cst_6 : f32 to vector<8x16xf32>
    %22 = arith.mulf %14, %21 : vector<8x16xf32>
    %23 = arith.subf %20, %22 : vector<8x16xf32>
    %cst_7 = arith.constant 6.07710063E-11 : f32
    %24 = vector.broadcast %cst_7 : f32 to vector<8x16xf32>
    %25 = arith.mulf %14, %24 : vector<8x16xf32>
    %26 = arith.subf %23, %25 : vector<8x16xf32>
    %27 = arith.mulf %26, %26 : vector<8x16xf32>
    %cst_8 = arith.constant -1.95152956E-4 : f32
    %28 = vector.broadcast %cst_8 : f32 to vector<8x16xf32>
    %29 = arith.mulf %28, %27 : vector<8x16xf32>
    %cst_9 = arith.constant 0.00833216123 : f32
    %30 = vector.broadcast %cst_9 : f32 to vector<8x16xf32>
    %31 = arith.addf %29, %30 : vector<8x16xf32>
    %32 = arith.mulf %31, %27 : vector<8x16xf32>
    %cst_10 = arith.constant -0.166666552 : f32
    %33 = vector.broadcast %cst_10 : f32 to vector<8x16xf32>
    %34 = arith.addf %32, %33 : vector<8x16xf32>
    %35 = arith.mulf %26, %27 : vector<8x16xf32>
    %36 = arith.mulf %35, %34 : vector<8x16xf32>
    %37 = arith.addf %26, %36 : vector<8x16xf32>
    %cst_11 = arith.constant 2.44331568E-5 : f32
    %38 = vector.broadcast %cst_11 : f32 to vector<8x16xf32>
    %39 = arith.mulf %38, %27 : vector<8x16xf32>
    %cst_12 = arith.constant -0.00138873165 : f32
    %40 = vector.broadcast %cst_12 : f32 to vector<8x16xf32>
    %41 = arith.addf %39, %40 : vector<8x16xf32>
    %42 = arith.mulf %41, %27 : vector<8x16xf32>
    %cst_13 = arith.constant 0.0416666456 : f32
    %43 = vector.broadcast %cst_13 : f32 to vector<8x16xf32>
    %44 = arith.addf %42, %43 : vector<8x16xf32>
    %cst_14 = arith.constant 5.000000e-01 : f32
    %45 = vector.broadcast %cst_14 : f32 to vector<8x16xf32>
    %46 = arith.mulf %45, %27 : vector<8x16xf32>
    %cst_15 = arith.constant 1.000000e+00 : f32
    %47 = vector.broadcast %cst_15 : f32 to vector<8x16xf32>
    %48 = arith.subf %47, %46 : vector<8x16xf32>
    %49 = arith.mulf %27, %27 : vector<8x16xf32>
    %50 = arith.mulf %49, %44 : vector<8x16xf32>
    %51 = arith.addf %48, %50 : vector<8x16xf32>
    %52 = arith.fptosi %14 : vector<8x16xf32> to vector<8x16xi32>
    %c1_i32_16 = arith.constant 1 : i32
    %53 = vector.broadcast %c1_i32_16 : i32 to vector<8x16xi32>
    %54 = arith.andi %52, %53 : vector<8x16xi32>
    %c1_i32_17 = arith.constant 1 : i32
    %55 = vector.broadcast %c1_i32_17 : i32 to vector<8x16xi32>
    %56 = arith.cmpi eq, %54, %55 : vector<8x16xi32>
    %57 = arith.select %56, %51, %37 : vector<8x16xi1>, vector<8x16xf32>
    %58 = arith.select %56, %37, %51 : vector<8x16xi1>, vector<8x16xf32>
    %c2_i32 = arith.constant 2 : i32
    %59 = vector.broadcast %c2_i32 : i32 to vector<8x16xi32>
    %60 = arith.andi %52, %59 : vector<8x16xi32>
    %c2_i32_18 = arith.constant 2 : i32
    %61 = vector.broadcast %c2_i32_18 : i32 to vector<8x16xi32>
    %62 = arith.cmpi eq, %60, %61 : vector<8x16xi32>
    %cst_19 = arith.constant 0.000000e+00 : f32
    %63 = vector.broadcast %cst_19 : f32 to vector<8x16xf32>
    %64 = arith.subf %63, %57 : vector<8x16xf32>
    %65 = arith.select %62, %64, %57 : vector<8x16xi1>, vector<8x16xf32>
    %c1_i32_20 = arith.constant 1 : i32
    %66 = vector.broadcast %c1_i32_20 : i32 to vector<8x16xi32>
    %67 = arith.addi %52, %66 : vector<8x16xi32>
    %c2_i32_21 = arith.constant 2 : i32
    %68 = vector.broadcast %c2_i32_21 : i32 to vector<8x16xi32>
    %69 = arith.andi %67, %68 : vector<8x16xi32>
    %c2_i32_22 = arith.constant 2 : i32
    %70 = vector.broadcast %c2_i32_22 : i32 to vector<8x16xi32>
    %71 = arith.cmpi eq, %69, %70 : vector<8x16xi32>
    %cst_23 = arith.constant 0.000000e+00 : f32
    %72 = vector.broadcast %cst_23 : f32 to vector<8x16xf32>
    %73 = arith.subf %72, %58 : vector<8x16xf32>
    %74 = arith.select %71, %73, %58 : vector<8x16xi1>, vector<8x16xf32>
    %75 = arith.index_cast %4 : i32 to index
    %c0_24 = arith.constant 0 : index
    %76 = vector.load %arg3[%75, %c0_24] : memref<8x32xf32, #tpu.memory_space<vmem>>, vector<8x16xf32>
    tpu.vector_store %arg3[%75, %c0_24], %74 {strides = array<i32>} : memref<8x32xf32, #tpu.memory_space<vmem>>, vector<8x16xf32>,
    %77 = arith.index_cast %4 : i32 to index
    %c16 = arith.constant 16 : index
    %78 = vector.load %arg3[%77, %c16] : memref<8x32xf32, #tpu.memory_space<vmem>>, vector<8x16xf32>
    tpu.vector_store %arg3[%77, %c16], %65 {strides = array<i32>} : memref<8x32xf32, #tpu.memory_space<vmem>>, vector<8x16xf32>,
    %c1_i32_25 = arith.constant 1 : i32
    return
  }
  func.func @transform_0(%arg0: i32) -> (i32, i32) {
    %c0_i32 = arith.constant 0 : i32
    %c0_i32_0 = arith.constant 0 : i32
    return %arg0, %c0_i32 : i32, i32
  }
  func.func @transform_1(%arg0: i32) -> (i32, i32) {
    %c0_i32 = arith.constant 0 : i32
    %c0_i32_0 = arith.constant 0 : i32
    %c0_i32_1 = arith.constant 0 : i32
    return %c0_i32, %c0_i32_0 : i32, i32
  }
  func.func @transform_2(%arg0: i32) -> (i32, i32) {
    %c0_i32 = arith.constant 0 : i32
    %c0_i32_0 = arith.constant 0 : i32
    return %arg0, %c0_i32 : i32, i32
  }
}

</mosaic_0001>

<bundles_post_ra>
// kernel: tpu_custom_call.1
= control target key start
LH: loop header
LB: loop body
LE: loop exit
PB: predicated region body
PF: predicated region fallthrough
CT: control target
= control target key end

     0   :  { %s149_s0 = inlined_call_operand.vmem [shape: f32[8,1], index: 0, kind: input, shape index: {}]   ;;  %s150_s1 = inlined_call_operand.vmem [shape: f32[1,16], index: 1, kind: input, shape index: {}]   ;;  %s151_s2 = inlined_call_operand.hbm [shape: f32[8,32], index: 2, kind: output, shape index: {}]  }
   0x1   :  { %v13_v0 = vld [vmem:[%s149_s0] sm:$0xff] }
   0x2   :  { %7 = vsyncpa [#allocation3], 0  ;;  %v122_v1 = vmov 0   ;;  %v95_v2 = vld [vmem:[%s150_s1] ss:$0 sm:$0xff]  ;;  %vm65_vm1 = vcmask 130048  }
   0x3   :  { %94 = vset.pattern.permute.xlu0 %v122_v1  ;;  %s123_s0 = smov 16   ;;  %s124_s1 = smov [#allocation2]   ;;  %vm71_vm4 = vcmask 261248  }
   0x4   :  { %16 = vperm.xlu0 %94, %v13_v0   ;;  %s78_s13 = sshll.u32 %s124_s1, 4  ;;  %s80_s16 = sshll.u32 %s151_s2, 4  ;;  %s79_s13 = int_to_ptr.vmem [resolvable:$true] %s78_s13  ;;  %s81_s16 = int_to_ptr.hbm [resolvable:$true] %s80_s16 }
  0x76   :  { %v17_v3 = vpop.permute.xlu0 %16 }
  0x77   :  { %v22_v4 = vmul.f32 %v95_v2, %v17_v3 }
  0x79   :  { %v23_v5 = vmul.f32 0.63661975, %v22_v4 }
  0x7b   :  { %v24_v6 = vadd.f32 0.5, %v23_v5 }
  0x7d   :  { %v25_v7 = vfloor.f32 %v24_v6 }
  0x7f   :  { %v26_v8 = vmul.f32 1.5703125, %v25_v7  ;;  %v28_v10 = vmul.f32 0.00048351288, %v25_v7  ;;  %v30_v12 = vmul.f32 3.138557e-07, %v25_v7  ;;  %v32_v14 = vmul.f32 6.0771006e-11, %v25_v7 }
  0x80   :  { %v90_v19 = vcvt.f32.s32 %v25_v7 }
  0x81   :  { %v27_v9 = vsub.f32 %v22_v4, %v26_v8 }
  0x82   :  { %v60_v25 = vadd.s32 1, %v90_v19  ;;  %v52_v30 = vand.u32 1, %v90_v19  ;;  %v56_v36 = vand.u32 2, %v90_v19 }
  0x83   :  { %v29_v11 = vsub.f32 %v27_v9, %v28_v10 }
  0x84   :  { %v61_v37 = vand.u32 2, %v60_v25  ;;  %vm53_vm0 = vcmp.eq.s32.totalorder %v52_v30, 1  ;;  %vm57_vm2 = vcmp.eq.s32.totalorder %v56_v36, 2 }
  0x85   :  { %v31_v13 = vsub.f32 %v29_v11, %v30_v12 }
  0x86   :  { %vm62_vm3 = vcmp.eq.s32.totalorder %v61_v37, 2 }
  0x87   :  { %v33_v15 = vsub.f32 %v31_v13, %v32_v14 }
  0x89   :  { %v34_v16 = vmul.f32 %v33_v15, %v33_v15 }
  0x8b   :  { %v35_v17 = vmul.f32 -0.00019515296, %v34_v16  ;;  %v42_v18 = vmul.f32 2.4433157e-05, %v34_v16  ;;  %v46_v24 = vmul.f32 0.5, %v34_v16  ;;  %v39_v27 = vmul.f32 %v34_v16, %v33_v15 }
  0x8c   :  { %v48_v29 = vmul.f32 %v34_v16, %v34_v16 }
  0x8d   :  { %v36_v20 = vadd.f32 0.008332161, %v35_v17  ;;  %v43_v21 = vadd.f32 -0.0013887316, %v42_v18  ;;  %v47_v32 = vsub.f32 1.0, %v46_v24 }
  0x8f   :  { %v37_v22 = vmul.f32 %v36_v20, %v34_v16  ;;  %v44_v23 = vmul.f32 %v43_v21, %v34_v16 }
  0x91   :  { %v38_v26 = vadd.f32 -0.16666655, %v37_v22  ;;  %v45_v28 = vadd.f32 0.041666646, %v44_v23 }
  0x93   :  { %v40_v31 = vmul.f32 %v39_v27, %v38_v26  ;;  %v49_v33 = vmul.f32 %v48_v29, %v45_v28 }
  0x95   :  { %v41_v34 = vadd.f32 %v40_v31, %v33_v15  ;;  %v50_v35 = vadd.f32 %v49_v33, %v47_v32 }
  0x97   :  { %v54_v38 = vsel %vm53_vm0, %v50_v35, %v41_v34  ;;  %v55_v39 = vsel %vm53_vm0, %v41_v34, %v50_v35 }
  0x98   :  { %v58_v40 = vsub.f32 0.0, %v54_v38  ;;  %v63_v41 = vsub.f32 0.0, %v55_v39 }
  0x9a   :  { %v59_v42 = vsel %vm57_vm2, %v58_v40, %v54_v38  ;;  %v64_v43 = vsel %vm62_vm3, %v63_v41, %v55_v39 }
  0x9b   :  { %68 = vrot.lane.b32.xlu0 %v59_v42, %s123_s0  ;;  %66 = vst.msk [vmem:[#allocation2] sm:$0xff] %vm65_vm1, %v64_v43 }
 0x10d   :  { %v69_v44 = vpop.permute.xlu0 %68 }
 0x10e   :  { %72 = vst.msk [vmem:[#allocation2] sm:$0xff] %vm71_vm4, %v69_v44 }
 0x10f   :  { %83 = dma.vmem_to_hbm [thread:$0]  %s79_s13, 128, %s81_s16, [#allocation3]  }
 0x110   :  { %120 = dma.done.wait [#allocation3], 128  }
 0x111   :  { %121 = vsyncadd [#allocation3], 4294967168 }
 0x112   :  { %88 = vsyncpa [#allocation3], 1 }

</bundles_post_ra>
